<compile_context>
chip_gen: v7x
topology: tpu7x:2x2x1
jax: 0.10.0
libtpu: 0.0.40
codegen_flags: <defaults>
</compile_context>

<pallas_src>
import functools

import jax
import jax.numpy as jnp
from jax.experimental import pallas as pl
from jax.experimental.pallas import tpu as pltpu


def _conv_bn_relu_kernel(x_ref, w_ref, scale_ref, bias_ref, out_ref, *,
                         Wp, PE, Lout):
    # x_ref     : (1, 3*Cin, Lt)   bf16, lane = dl*P + padded-plane (+PE slack);
    #             row kd*Cin + ci holds the input pre-shifted by kd depth rows.
    # w_ref     : (9, Cout, 3*Cin) bf16, tap index = kh*3 + kw, K = (kd, ci).
    # scale/bias: (Cout, 1)        f32  (folded conv-bias + BatchNorm).
    # out_ref   : (1, Cout, Lout)  bf16, Lout = tD*P lane-dense output slab.
    x = x_ref[0]                       # (3*Cin, Lt) bf16 -- stays bf16 for MXU
    scale = scale_ref[...]             # (Cout, 1) f32
    bias = bias_ref[...]

    acc = None
    t = 0
    for kh in range(3):
        for kw in range(3):
            # One in-plane tap = one static lane-offset slice feeding one
            # (Cout, 3*Cin) @ (3*Cin, tD*P) bf16 dot with f32 accumulation.
            off = PE + (kh - 1) * Wp + (kw - 1)
            a = x[:, off:off + Lout]                              # (3*Cin, Lout)
            d = jnp.dot(w_ref[t], a, preferred_element_type=jnp.float32)
            acc = d if acc is None else acc + d
            t += 1

    y = jnp.maximum(acc * scale + bias, 0.0)         # fused BN + ReLU (f32)
    out_ref[0] = y.astype(out_ref.dtype)             # one lane-dense bf16 store


def input_block_forward(x_ncdhw, weight_oidhw, conv_bias, gamma, beta,
                        running_mean, running_var, eps=1e-5, tile_d=8):
    """InputBlock forward: Conv3d(k=3, p=1) + BatchNorm3d(eval) + ReLU.

    x: (N, Cin, D, H, W) float  ->  (N, Cout, D, H, W) bfloat16.
    """
    N, Cin, D, H, W = x_ncdhw.shape
    Cout = weight_oidhw.shape[0]

    Hp, Wp = H + 2, W + 2
    P = Hp * Wp                      # flattened padded plane
    PE = Wp + 1                      # max |in-plane tap shift| -> lane slack

    # Depth tile: biggest divisor of D <= tile_d; keep >= 2 grid steps when
    # possible so v7x's two TensorCores both get work.
    max_td = min(tile_d, D)
    if N == 1 and D > 1:
        max_td = min(max_td, max(1, D // 2))
    tD = max(t for t in range(1, max_td + 1) if D % t == 0)
    nD = D // tD
    Lout = tD * P                    # output lanes per grid step
    Lt = Lout + 2 * PE               # input lanes per grid step (with slack)

    # ---- activations: bf16, zero-pad (D,H,W) by 1, flatten (depth, plane)
    # into one lane axis, then per depth-tile stack the 3 depth taps along the
    # channel axis (K axis has no zero padding, no in-kernel concat needed).
    xb = x_ncdhw.astype(jnp.bfloat16)
    xb = jnp.pad(xb, ((0, 0), (0, 0), (1, 1), (1, 1), (1, 1)))   # (N,Cin,D+2,Hp,Wp)
    fflat = xb.reshape(N, Cin, (D + 2) * P)
    fpad = jnp.pad(fflat, ((0, 0), (0, 0), (PE, PE)))
    xs = jnp.stack(
        [jnp.concatenate(
            [fpad[:, :, (j * tD + kd) * P:(j * tD + kd) * P + Lt]
             for kd in range(3)], axis=1)
         for j in range(nD)], axis=1)                            # (N,nD,3*Cin,Lt)
    xs = xs.reshape(N * nD, 3 * Cin, Lt)

    # ---- weights: (Cout, Cin, kd, kh, kw) -> (9, Cout, 3*Cin), tap = kh*3+kw
    w9 = jnp.transpose(weight_oidhw, (3, 4, 0, 2, 1))            # (kh,kw,co,kd,ci)
    w9 = w9.reshape(9, Cout, 3 * Cin).astype(jnp.bfloat16)

    # ---- fold conv bias + BatchNorm (inference) into per-channel scale/bias
    inv_std = jax.lax.rsqrt(running_var.astype(jnp.float32) + eps)
    scale = gamma.astype(jnp.float32) * inv_std
    bias = (conv_bias.astype(jnp.float32)
            - running_mean.astype(jnp.float32)) * scale + beta.astype(jnp.float32)
    scale2 = scale.reshape(Cout, 1)
    bias2 = bias.reshape(Cout, 1)

    kernel = functools.partial(_conv_bn_relu_kernel, Wp=Wp, PE=PE, Lout=Lout)

    flops = 2 * (N * nD) * 9 * Cout * (3 * Cin) * Lout
    bytes_accessed = (xs.size * 2 + w9.size * 2 + 2 * Cout * 4
                      + (N * nD) * Cout * Lout * 2)

    out = pl.pallas_call(
        kernel,
        out_shape=jax.ShapeDtypeStruct((N * nD, Cout, Lout), jnp.bfloat16),
        grid=(N * nD,),
        in_specs=[
            pl.BlockSpec((1, 3 * Cin, Lt), lambda i: (i, 0, 0)),
            pl.BlockSpec((9, Cout, 3 * Cin), lambda i: (0, 0, 0)),
            pl.BlockSpec((Cout, 1), lambda i: (0, 0)),
            pl.BlockSpec((Cout, 1), lambda i: (0, 0)),
        ],
        out_specs=pl.BlockSpec((1, Cout, Lout), lambda i: (i, 0, 0)),
        compiler_params=pltpu.CompilerParams(
            dimension_semantics=("parallel",),
            vmem_limit_bytes=64 * 1024 * 1024),
        cost_estimate=pl.CostEstimate(flops=flops, transcendentals=0,
                                      bytes_accessed=bytes_accessed),
    )(xs, w9, scale2, bias2)

    # (N*nD, Cout, tD*Hp*Wp) -> drop the 1-voxel plane border -> NCDHW (bf16)
    out = out.reshape(N, nD, Cout, tD, Hp, Wp)[:, :, :, :, 1:H + 1, 1:W + 1]
    out = jnp.transpose(out, (0, 2, 1, 3, 4, 5)).reshape(N, Cout, D, H, W)
    return out


def _reference(x, weight, conv_bias, gamma, beta, rmean, rvar, eps=1e-5):
    dn = jax.lax.conv_dimension_numbers(x.shape, weight.shape,
                                        ("NCDHW", "OIDHW", "NCDHW"))
    conv = jax.lax.conv_general_dilated(
        x, weight, window_strides=(1, 1, 1),
        padding=((1, 1), (1, 1), (1, 1)), dimension_numbers=dn)
    Cout = weight.shape[0]
    conv = conv + conv_bias.reshape(1, Cout, 1, 1, 1)
    bn = (conv - rmean.reshape(1, Cout, 1, 1, 1)) \
        / jnp.sqrt(rvar.reshape(1, Cout, 1, 1, 1) + eps) \
        * gamma.reshape(1, Cout, 1, 1, 1) + beta.reshape(1, Cout, 1, 1, 1)
    return jnp.maximum(bn, 0.0)


if __name__ == "__main__":
    key = jax.random.PRNGKey(0)
    k_x, k_w, k_b, k_g, k_be, k_m, k_v = jax.random.split(key, 7)

    N, Cin, Cout = 2, 4, 8
    D = H = W = 8

    x = jax.random.normal(k_x, (N, Cin, D, H, W), jnp.float32)               # NCDHW
    weight = 0.1 * jax.random.normal(k_w, (Cout, Cin, 3, 3, 3), jnp.float32)  # OIDHW
    conv_bias = 0.1 * jax.random.normal(k_b, (Cout,), jnp.float32)
    gamma = 1.0 + 0.1 * jax.random.normal(k_g, (Cout,), jnp.float32)
    beta = 0.1 * jax.random.normal(k_be, (Cout,), jnp.float32)
    running_mean = 0.1 * jax.random.normal(k_m, (Cout,), jnp.float32)
    running_var = jax.random.uniform(k_v, (Cout,), jnp.float32,
                                     minval=0.5, maxval=1.5)

    fwd = jax.jit(input_block_forward)
    out = jax.block_until_ready(
        fwd(x, weight, conv_bias, gamma, beta, running_mean, running_var))

    # Reference on the same bf16-quantized activations/weights (the kernel
    # ships x / w as bf16, accumulates in f32, and emits bf16 output).
    x_q = x.astype(jnp.bfloat16).astype(jnp.float32)
    w_q = weight.astype(jnp.bfloat16).astype(jnp.float32)
    ref = _reference(x_q, w_q, conv_bias, gamma, beta,
                     running_mean, running_var)

    assert out.shape == (N, Cout, D, H, W)
    assert out.dtype == jnp.bfloat16
    out_f32 = out.astype(jnp.float32)
    err = jnp.max(jnp.abs(out_f32 - ref))
    assert jnp.allclose(out_f32, ref, rtol=2e-2, atol=2e-2), f"max abs err = {err}"

    print("KERNEL_OK")
</pallas_src>

<mosaic_0001>
module attributes {stable_mosaic.version = 11 : i64} {
  func.func @_conv_bn_relu_kernel(%arg0: i32, %arg1: memref<1x12x822xbf16, #tpu.memory_space<vmem>>, %arg2: memref<9x8x12xbf16, #tpu.memory_space<vmem>>, %arg3: memref<8x1xf32, #tpu.memory_space<vmem>>, %arg4: memref<8x1xf32, #tpu.memory_space<vmem>>, %arg5: memref<1x8x800xbf16, #tpu.memory_space<vmem>>) attributes {dimension_semantics = [#tpu.dimension_semantics<parallel>], iteration_bounds = array<i64: 2>, scalar_prefetch = 0 : i64, scratch_operands = 0 : i64, tpu.core_type = #tpu.core_type<tc>, window_params = [{transform_indices = @transform_0, window_bounds = array<i64: 1, 12, 822>}, {pipeline_mode = #tpu.pipeline_mode<synchronous>, transform_indices = @transform_1, window_bounds = array<i64: 9, 8, 12>}, {pipeline_mode = #tpu.pipeline_mode<synchronous>, transform_indices = @transform_2, window_bounds = array<i64: 8, 1>}, {pipeline_mode = #tpu.pipeline_mode<synchronous>, transform_indices = @transform_3, window_bounds = array<i64: 8, 1>}, {transform_indices = @transform_4, window_bounds = array<i64: 1, 8, 800>}]} {
    %c0 = arith.constant 0 : index
    %c0_0 = arith.constant 0 : index
    %c0_1 = arith.constant 0 : index
    %0 = vector.load %arg1[%c0, %c0_0, %c0_1] : memref<1x12x822xbf16, #tpu.memory_space<vmem>>, vector<1x12x822xbf16>
    %1 = vector.shape_cast %0 : vector<1x12x822xbf16> to vector<12x822xbf16>
    %c0_2 = arith.constant 0 : index
    %c0_3 = arith.constant 0 : index
    %2 = vector.load %arg3[%c0_2, %c0_3] : memref<8x1xf32, #tpu.memory_space<vmem>>, vector<8x1xf32>
    %c0_4 = arith.constant 0 : index
    %c0_5 = arith.constant 0 : index
    %3 = vector.load %arg4[%c0_4, %c0_5] : memref<8x1xf32, #tpu.memory_space<vmem>>, vector<8x1xf32>
    %4 = vector.extract_strided_slice %1 {offsets = [0, 0], sizes = [12, 800], strides = [1, 1]} : vector<12x822xbf16> to vector<12x800xbf16>
    %c0_6 = arith.constant 0 : index
    %c0_7 = arith.constant 0 : index
    %c0_8 = arith.constant 0 : index
    %5 = vector.load %arg2[%c0_6, %c0_7, %c0_8] : memref<9x8x12xbf16, #tpu.memory_space<vmem>>, vector<1x8x12xbf16>
    %6 = vector.shape_cast %5 : vector<1x8x12xbf16> to vector<8x12xbf16>
    %cst = arith.constant dense<0.000000e+00> : vector<8x800xf32>
    %7 = tpu.matmul %6, %4, %cst {dimension_numbers = #tpu.dot_dimension_numbers<[1], [0], [0], [1], [0, 0, 1, 1], [], []>} : vector<8x12xbf16>, vector<12x800xbf16>, vector<8x800xf32> -> vector<8x800xf32>
    %8 = vector.extract_strided_slice %1 {offsets = [0, 1], sizes = [12, 800], strides = [1, 1]} : vector<12x822xbf16> to vector<12x800xbf16>
    %c1 = arith.constant 1 : index
    %c0_9 = arith.constant 0 : index
    %c0_10 = arith.constant 0 : index
    %9 = vector.load %arg2[%c1, %c0_9, %c0_10] : memref<9x8x12xbf16, #tpu.memory_space<vmem>>, vector<1x8x12xbf16>
    %10 = vector.shape_cast %9 : vector<1x8x12xbf16> to vector<8x12xbf16>
    %cst_11 = arith.constant dense<0.000000e+00> : vector<8x800xf32>
    %11 = tpu.matmul %10, %8, %cst_11 {dimension_numbers = #tpu.dot_dimension_numbers<[1], [0], [0], [1], [0, 0, 1, 1], [], []>} : vector<8x12xbf16>, vector<12x800xbf16>, vector<8x800xf32> -> vector<8x800xf32>
    %12 = arith.addf %7, %11 : vector<8x800xf32>
    %13 = vector.extract_strided_slice %1 {offsets = [0, 2], sizes = [12, 800], strides = [1, 1]} : vector<12x822xbf16> to vector<12x800xbf16>
    %c2 = arith.constant 2 : index
    %c0_12 = arith.constant 0 : index
    %c0_13 = arith.constant 0 : index
    %14 = vector.load %arg2[%c2, %c0_12, %c0_13] : memref<9x8x12xbf16, #tpu.memory_space<vmem>>, vector<1x8x12xbf16>
    %15 = vector.shape_cast %14 : vector<1x8x12xbf16> to vector<8x12xbf16>
    %cst_14 = arith.constant dense<0.000000e+00> : vector<8x800xf32>
    %16 = tpu.matmul %15, %13, %cst_14 {dimension_numbers = #tpu.dot_dimension_numbers<[1], [0], [0], [1], [0, 0, 1, 1], [], []>} : vector<8x12xbf16>, vector<12x800xbf16>, vector<8x800xf32> -> vector<8x800xf32>
    %17 = arith.addf %12, %16 : vector<8x800xf32>
    %18 = vector.extract_strided_slice %1 {offsets = [0, 10], sizes = [12, 800], strides = [1, 1]} : vector<12x822xbf16> to vector<12x800xbf16>
    %c3 = arith.constant 3 : index
    %c0_15 = arith.constant 0 : index
    %c0_16 = arith.constant 0 : index
    %19 = vector.load %arg2[%c3, %c0_15, %c0_16] : memref<9x8x12xbf16, #tpu.memory_space<vmem>>, vector<1x8x12xbf16>
    %20 = vector.shape_cast %19 : vector<1x8x12xbf16> to vector<8x12xbf16>
    %cst_17 = arith.constant dense<0.000000e+00> : vector<8x800xf32>
    %21 = tpu.matmul %20, %18, %cst_17 {dimension_numbers = #tpu.dot_dimension_numbers<[1], [0], [0], [1], [0, 0, 1, 1], [], []>} : vector<8x12xbf16>, vector<12x800xbf16>, vector<8x800xf32> -> vector<8x800xf32>
    %22 = arith.addf %17, %21 : vector<8x800xf32>
    %23 = vector.extract_strided_slice %1 {offsets = [0, 11], sizes = [12, 800], strides = [1, 1]} : vector<12x822xbf16> to vector<12x800xbf16>
    %c4 = arith.constant 4 : index
    %c0_18 = arith.constant 0 : index
    %c0_19 = arith.constant 0 : index
    %24 = vector.load %arg2[%c4, %c0_18, %c0_19] : memref<9x8x12xbf16, #tpu.memory_space<vmem>>, vector<1x8x12xbf16>
    %25 = vector.shape_cast %24 : vector<1x8x12xbf16> to vector<8x12xbf16>
    %cst_20 = arith.constant dense<0.000000e+00> : vector<8x800xf32>
    %26 = tpu.matmul %25, %23, %cst_20 {dimension_numbers = #tpu.dot_dimension_numbers<[1], [0], [0], [1], [0, 0, 1, 1], [], []>} : vector<8x12xbf16>, vector<12x800xbf16>, vector<8x800xf32> -> vector<8x800xf32>
    %27 = arith.addf %22, %26 : vector<8x800xf32>
    %28 = vector.extract_strided_slice %1 {offsets = [0, 12], sizes = [12, 800], strides = [1, 1]} : vector<12x822xbf16> to vector<12x800xbf16>
    %c5 = arith.constant 5 : index
    %c0_21 = arith.constant 0 : index
    %c0_22 = arith.constant 0 : index
    %29 = vector.load %arg2[%c5, %c0_21, %c0_22] : memref<9x8x12xbf16, #tpu.memory_space<vmem>>, vector<1x8x12xbf16>
    %30 = vector.shape_cast %29 : vector<1x8x12xbf16> to vector<8x12xbf16>
    %cst_23 = arith.constant dense<0.000000e+00> : vector<8x800xf32>
    %31 = tpu.matmul %30, %28, %cst_23 {dimension_numbers = #tpu.dot_dimension_numbers<[1], [0], [0], [1], [0, 0, 1, 1], [], []>} : vector<8x12xbf16>, vector<12x800xbf16>, vector<8x800xf32> -> vector<8x800xf32>
    %32 = arith.addf %27, %31 : vector<8x800xf32>
    %33 = vector.extract_strided_slice %1 {offsets = [0, 20], sizes = [12, 800], strides = [1, 1]} : vector<12x822xbf16> to vector<12x800xbf16>
    %c6 = arith.constant 6 : index
    %c0_24 = arith.constant 0 : index
    %c0_25 = arith.constant 0 : index
    %34 = vector.load %arg2[%c6, %c0_24, %c0_25] : memref<9x8x12xbf16, #tpu.memory_space<vmem>>, vector<1x8x12xbf16>
    %35 = vector.shape_cast %34 : vector<1x8x12xbf16> to vector<8x12xbf16>
    %cst_26 = arith.constant dense<0.000000e+00> : vector<8x800xf32>
    %36 = tpu.matmul %35, %33, %cst_26 {dimension_numbers = #tpu.dot_dimension_numbers<[1], [0], [0], [1], [0, 0, 1, 1], [], []>} : vector<8x12xbf16>, vector<12x800xbf16>, vector<8x800xf32> -> vector<8x800xf32>
    %37 = arith.addf %32, %36 : vector<8x800xf32>
    %38 = vector.extract_strided_slice %1 {offsets = [0, 21], sizes = [12, 800], strides = [1, 1]} : vector<12x822xbf16> to vector<12x800xbf16>
    %c7 = arith.constant 7 : index
    %c0_27 = arith.constant 0 : index
    %c0_28 = arith.constant 0 : index
    %39 = vector.load %arg2[%c7, %c0_27, %c0_28] : memref<9x8x12xbf16, #tpu.memory_space<vmem>>, vector<1x8x12xbf16>
    %40 = vector.shape_cast %39 : vector<1x8x12xbf16> to vector<8x12xbf16>
    %cst_29 = arith.constant dense<0.000000e+00> : vector<8x800xf32>
    %41 = tpu.matmul %40, %38, %cst_29 {dimension_numbers = #tpu.dot_dimension_numbers<[1], [0], [0], [1], [0, 0, 1, 1], [], []>} : vector<8x12xbf16>, vector<12x800xbf16>, vector<8x800xf32> -> vector<8x800xf32>
    %42 = arith.addf %37, %41 : vector<8x800xf32>
    %43 = vector.extract_strided_slice %1 {offsets = [0, 22], sizes = [12, 800], strides = [1, 1]} : vector<12x822xbf16> to vector<12x800xbf16>
    %c8 = arith.constant 8 : index
    %c0_30 = arith.constant 0 : index
    %c0_31 = arith.constant 0 : index
    %44 = vector.load %arg2[%c8, %c0_30, %c0_31] : memref<9x8x12xbf16, #tpu.memory_space<vmem>>, vector<1x8x12xbf16>
    %45 = vector.shape_cast %44 : vector<1x8x12xbf16> to vector<8x12xbf16>
    %cst_32 = arith.constant dense<0.000000e+00> : vector<8x800xf32>
    %46 = tpu.matmul %45, %43, %cst_32 {dimension_numbers = #tpu.dot_dimension_numbers<[1], [0], [0], [1], [0, 0, 1, 1], [], []>} : vector<8x12xbf16>, vector<12x800xbf16>, vector<8x800xf32> -> vector<8x800xf32>
    %47 = arith.addf %42, %46 : vector<8x800xf32>
    %48 = vector.broadcast %2 : vector<8x1xf32> to vector<8x800xf32>
    %49 = arith.mulf %47, %48 : vector<8x800xf32>
    %50 = vector.broadcast %3 : vector<8x1xf32> to vector<8x800xf32>
    %51 = arith.addf %49, %50 : vector<8x800xf32>
    %cst_33 = arith.constant 0.000000e+00 : f32
    %52 = vector.broadcast %cst_33 : f32 to vector<8x800xf32>
    %53 = arith.maximumf %51, %52 : vector<8x800xf32>
    %54 = arith.truncf %53 : vector<8x800xf32> to vector<8x800xbf16>
    %c0_34 = arith.constant 0 : index
    %c0_35 = arith.constant 0 : index
    %c0_36 = arith.constant 0 : index
    %55 = vector.load %arg5[%c0_34, %c0_35, %c0_36] : memref<1x8x800xbf16, #tpu.memory_space<vmem>>, vector<1x8x800xbf16>
    %56 = vector.shape_cast %55 : vector<1x8x800xbf16> to vector<8x800xbf16>
    %57 = vector.shape_cast %54 : vector<8x800xbf16> to vector<1x8x800xbf16>
    tpu.vector_store %arg5[%c0_34, %c0_35, %c0_36], %57 {strides = array<i32>} : memref<1x8x800xbf16, #tpu.memory_space<vmem>>, vector<1x8x800xbf16>,
    return
  }
  func.func @transform_0(%arg0: i32) -> (i32, i32, i32) {
    %c0_i32 = arith.constant 0 : i32
    %c0_i32_0 = arith.constant 0 : i32
    %c0_i32_1 = arith.constant 0 : i32
    return %arg0, %c0_i32, %c0_i32_0 : i32, i32, i32
  }
  func.func @transform_1(%arg0: i32) -> (i32, i32, i32) {
    %c0_i32 = arith.constant 0 : i32
    %c0_i32_0 = arith.constant 0 : i32
    %c0_i32_1 = arith.constant 0 : i32
    %c0_i32_2 = arith.constant 0 : i32
    return %c0_i32, %c0_i32_0, %c0_i32_1 : i32, i32, i32
  }
  func.func @transform_2(%arg0: i32) -> (i32, i32) {
    %c0_i32 = arith.constant 0 : i32
    %c0_i32_0 = arith.constant 0 : i32
    %c0_i32_1 = arith.constant 0 : i32
    return %c0_i32, %c0_i32_0 : i32, i32
  }
  func.func @transform_3(%arg0: i32) -> (i32, i32) {
    %c0_i32 = arith.constant 0 : i32
    %c0_i32_0 = arith.constant 0 : i32
    %c0_i32_1 = arith.constant 0 : i32
    return %c0_i32, %c0_i32_0 : i32, i32
  }
  func.func @transform_4(%arg0: i32) -> (i32, i32, i32) {
    %c0_i32 = arith.constant 0 : i32
    %c0_i32_0 = arith.constant 0 : i32
    %c0_i32_1 = arith.constant 0 : i32
    return %arg0, %c0_i32, %c0_i32_0 : i32, i32, i32
  }
}

</mosaic_0001>

<bundles_post_ra>
// kernel: input_block_forward.1
= control target key start
LH: loop header
LB: loop body
LE: loop exit
PB: predicated region body
PF: predicated region fallthrough
CT: control target
= control target key end

     0   :  { %9 = vsyncpa [#allocation3], 0  ;;  %s3568_s0 = inlined_call_operand.hbm [shape: bf16[2,12,822], index: 0, kind: input, shape index: {}]   ;;  %s3569_s1 = inlined_call_operand.hbm [shape: bf16[9,8,12], index: 1, kind: input, shape index: {}]   ;;  %s3570_s2 = inlined_call_operand.hbm [shape: f32[8,1], index: 2, kind: input, shape index: {}]   ;;  %s3571_s3 = inlined_call_operand.hbm [shape: f32[8,1], index: 3, kind: input, shape index: {}]   ;;  %s3572_s4 = inlined_call_operand.hbm [shape: bf16[2,8,800], index: 4, kind: output, shape index: {}]  }
   0x1   :  { %11 = vsyncpa [#allocation3 + $0x1], 0 }
   0x2   :  { %12 = vsyncpa [#allocation6], 0 }
   0x3   :  { %13 = vsyncpa [#allocation9], 0 }
   0x4   :  { %14 = vsyncpa [#allocation4], 0 }
   0x5   :  { %16 = vsyncpa [#allocation4 + $0x1], 0  ;;  %s3030_s15 = smov 0   ;;  %s3032_s16 = smov 0  }
   0x6   :  { %s3034_s17 = smov 0   ;;  %s3036_s18 = smov 0  }
   0x7 LB: > { %s3051_s19 = sadd.s32 4294967295, %s2983_s18   ;;  %s2394_s20 = sadd.s32 4294967294, %s2983_s18   ;;  %s2983_s18 = sphi %s3036_s18, %s3595_s18   ;;  %s2979_s17 = sphi %s3034_s17, %s3594_s17   ;;  %s2975_s16 = sphi %s3032_s16, %s3593_s16   ;;  %s2971_s15 = sphi %s3030_s15, %s3592_s15  }
   0x8   : > { %p42_p0 = scmp.ne.s32.totalorder %s2975_s16, %s2971_s15  ;;  %p3573_p1 = scmp.eq.s32.totalorder %s3051_s19, 0 }
   0x9   : > { %p135_p3 = scmp.eq.s32.totalorder %s2394_s20, 1  ;;  %p2395_p5 = scmp.ge.s32.totalorder %s2983_s18, 1 }
   0xa   : > { %p3060_p4 = por %p3573_p1, %p42_p0  ;;  %p142_p7 = scmp.lt.s32.totalorder %s2983_s18, 3 }
   0xb   : > { %p3065_p6 = por %p135_p3, %p42_p0  ;;  %s2985_s24 = smov [#allocation5]  }
   0xc   : > { %s3576_s21 = scalar_select %p3060_p4, 1, 0 }
   0xd   : > { %s3577_s22 = scalar_select %p3065_p6, 1, 0 }
   0xe   : > { %p3070_p8 = pnand %p2395_p5, %p142_p7  ;;  %s154_s25 = sshll.u32 %s2985_s24, 4  ;;  %s3074_s25 = int_to_ptr.vmem [resolvable:$true] %s154_s25 }
   0xf   : > { %s2986_s27 = smov [#allocation7]   ;;  %s2987_s29 = smov [#allocation8]  }
  0x10   : > { %s3578_s23 = scalar_select %p3070_p8, 1, 0 }
  0x11   : > { %p2707_p9 = pneg %p3070_p8  ;;  %s168_s28 = sshll.u32 %s2986_s27, 4  ;;  %s3085_s28 = int_to_ptr.vmem [resolvable:$true] %s168_s28 }
  0x12   : > { %s3087_s30 = sshll.u32 %s2987_s29, 4  ;;  %s2795_s7 = scalar_lea.hbm %s3569_s1, 576  ;;  %s180_s30 = int_to_ptr.vmem [resolvable:$true] %s3087_s30 }
  0x13   : > { %p3081_p11 = pnand %p2707_p9, %p3573_p1  ;;  %p2796_p12 = scmp.ne.s32.totalorder %s3569_s1, %s2795_s7 }
  0x14   : > { %p2802_p5 = scmp.lt.u32.totalorder %s2795_s7, %s3569_s1 }
  0x15   : > { %p3097_p13 = pneg %p3081_p11 }
  0x17   : > { %p2798_p0 = pnand %p3097_p13, %p2796_p12 }
  0x19   : > { %p2799_p3 = pneg %p2798_p0 }
  0x1b   : > { %p2804_p7 = pnand %p2802_p5, %p2799_p3 }
  0x1d   : > { %2807 = shalt.err (!%p2804_p7)
}
  0x1e   : > { %s2808_s13 = scalar_lea.vmem %s3074_s25, 576  ;;  %p2816_p2 = scmp.lt.s32.totalorder %s3074_s25, %s3074_s25 }
  0x1f   : > { %p2809_p9 = scmp.ne.s32.totalorder %s3074_s25, %s2808_s13  ;;  %p2817_p6 = scmp.lt.s32.totalorder %s2808_s13, %s2808_s13 }
  0x21   : > { %p2811_p10 = pnand %p2809_p9, %p3097_p13  ;;  %p2818_p12 = por %p2817_p6, %p2816_p2 }
  0x23   : > { %p2812_p1 = pneg %p2811_p10 }
  0x25   : > { %p2819_p0 = pnand %p2818_p12, %p2812_p1 }
  0x27   : > { %2822 = shalt.err (!%p2819_p0)
}
  0x28   : > { %s2988_s14 = smov 64   ;;  %s2989_s20 = smov 4  }
  0x29   : > { %2710 = dma.hbm_to_vmem [thread:$0]  (!%p3081_p11), %s3569_s1, 576, %s3074_s25, [#allocation6], %s2988_s14, %s2988_s14, %s2989_s20  }
  0x2a   : > { %s2823_s6 = scalar_lea.hbm %s3570_s2, 128 }
  0x2b   : > { %p2824_p2 = scmp.ne.s32.totalorder %s3570_s2, %s2823_s6  ;;  %p2830_p10 = scmp.lt.u32.totalorder %s2823_s6, %s3570_s2 }
  0x2d   : > { %p2826_p1 = pnand %p2824_p2, %p3097_p13 }
  0x2f   : > { %p2827_p6 = pneg %p2826_p1 }
  0x31   : > { %p2832_p3 = pnand %p2830_p10, %p2827_p6 }
  0x33   : > { %2835 = shalt.err (!%p2832_p3)
}
  0x34   : > { %s2836_s25 = scalar_lea.vmem %s3085_s28, 128  ;;  %p2844_p12 = scmp.lt.s32.totalorder %s3085_s28, %s3085_s28 }
  0x35   : > { %p2837_p5 = scmp.ne.s32.totalorder %s3085_s28, %s2836_s25  ;;  %p2845_p0 = scmp.lt.s32.totalorder %s2836_s25, %s2836_s25 }
  0x37   : > { %p2839_p7 = pnand %p2837_p5, %p3097_p13  ;;  %p2846_p2 = por %p2845_p0, %p2844_p12 }
  0x39   : > { %p2840_p9 = pneg %p2839_p7 }
  0x3b   : > { %p2847_p1 = pnand %p2846_p2, %p2840_p9 }
  0x3d   : > { %2850 = shalt.err (!%p2847_p1)
}
  0x3e   : > { %2713 = dma.hbm_to_vmem [thread:$0]  (!%p3081_p11), %s3570_s2, 128, %s3085_s28, [#allocation6]  }
  0x3f   : > { %s2851_s24 = scalar_lea.hbm %s3571_s3, 128 }
  0x40   : > { %p2852_p6 = scmp.ne.s32.totalorder %s3571_s3, %s2851_s24  ;;  %p2858_p5 = scmp.lt.u32.totalorder %s2851_s24, %s3571_s3 }
  0x42   : > { %p2854_p10 = pnand %p2852_p6, %p3097_p13 }
  0x44   : > { %p2855_p3 = pneg %p2854_p10 }
  0x46   : > { %p2860_p7 = pnand %p2858_p5, %p2855_p3 }
  0x48   : > { %2863 = shalt.err (!%p2860_p7)
}
  0x49   : > { %s2864_s7 = scalar_lea.vmem %s180_s30, 128  ;;  %p2872_p2 = scmp.lt.s32.totalorder %s180_s30, %s180_s30 }
  0x4a   : > { %p2865_p9 = scmp.ne.s32.totalorder %s180_s30, %s2864_s7  ;;  %p2873_p1 = scmp.lt.s32.totalorder %s2864_s7, %s2864_s7 }
  0x4c   : > { %p2867_p12 = pnand %p2865_p9, %p3097_p13  ;;  %p2874_p4 = por %p2873_p1, %p2872_p2 }
  0x4e   : > { %p2868_p0 = pneg %p2867_p12 }
  0x50   : > { %p2875_p8 = pnand %p2874_p4, %p2868_p0 }
  0x52   : > { %2878 = shalt.err (!%p2875_p8)
}
  0x53   : > { %2716 = dma.hbm_to_vmem [thread:$0]  (!%p3081_p11), %s3571_s3, 128, %s180_s30, [#allocation9]  }
  0x54   : > { %s3161_s10 = sadd.s32 1, %s2983_s18   ;;  %s29_s26 = sadd.s32 1, %s2979_s17 }
  0x55   : > { %s26_s9 = ssub.s32 %s2983_s18, %s3161_s10  ;;  %p36_p8 = scmp.ne.s32.totalorder %s2979_s17, %s2975_s16 }
  0x56   : > { %p27_p4 = scmp.eq.s32.totalorder %s26_s9, 0  ;;  %p37_p13 = scmp.eq.s32.totalorder %s2983_s18, 0 }
  0x57   : > { %p2728_p6 = scmp.lt.s32.totalorder %s2983_s18, 2  ;;  %p3581_p3 = scmp.eq.s32.totalorder %s3051_s19, 1 }
  0x58   : > { %s3171_s11 = scalar_select %p27_p4, %s2979_s17, %s29_s26  }
  0x59   : > { %p38_p10 = por %p37_p13, %p36_p8  ;;  %p3175_p5 = por %p3581_p3, %p36_p8 }
  0x5a   : > { %s190_s12 = sand.u32 1, %s2979_s17   ;;  %s2687_s13 = smul.u32 896, %s2983_s18 }
  0x5b   : > { %s2686_s30 = smul.u32 56, %s190_s12  ;;  %p3186_p11 = pnand %p2728_p6, %p38_p10 }
  0x5c   : > { %s3184_s24 = scalar_lea.hbm %s3568_s0, %s2687_s13  ;;  %s3192_s6 = scalar_lea.sflag [#allocation3], %s190_s12 }
  0x5d   : > { %s194_s29 = scalar_lea.vmem [#allocation2], %s2686_s30  ;;  %s2879_s7 = scalar_lea.hbm %s3184_s24, 896 }
  0x5e   : > { %s201_s5 = sshll.u32 %s194_s29, 4  ;;  %p2880_p7 = scmp.ne.s32.totalorder %s3184_s24, %s2879_s7  ;;  %s3190_s5 = int_to_ptr.vmem [resolvable:$true] %s201_s5 }
  0x5f   : > { %p2881_p9 = pneg %p3186_p11  ;;  %s2884_s9 = scalar_lea.hbm %s3568_s0, 1792 }
  0x60   : > { %p2885_p2 = scmp.lt.u32.totalorder %s3184_s24, %s3568_s0  ;;  %p2886_p1 = scmp.lt.u32.totalorder %s2884_s9, %s2879_s7 }
  0x61   : > { %p2882_p12 = pnand %p2881_p9, %p2880_p7  ;;  %p2888_p8 = scmp.lt.u32.totalorder %s2879_s7, %s3184_s24 }
  0x62   : > { %p2887_p4 = por %p2886_p1, %p2885_p2 }
  0x63   : > { %p2883_p0 = pneg %p2882_p12 }
  0x64   : > { %p2889_p13 = por %p2888_p8, %p2887_p4 }
  0x66   : > { %p2890_p6 = pnand %p2889_p13, %p2883_p0 }
  0x68   : > { %2893 = shalt.err (!%p2890_p6)
}
  0x69   : > { %s2894_s12 = scalar_lea.vmem %s3190_s5, 896  ;;  %s2990_s30 = smov [#allocation2]  }
  0x6a   : > { %p2895_p10 = scmp.ne.s32.totalorder %s3190_s5, %s2894_s12  ;;  %s2899_s14 = sshll.u32 %s2990_s30, 4  ;;  %s2900_s14 = int_to_ptr.vmem [resolvable:$false] %s2899_s14 }
  0x6b   : > { %s2901_s20 = scalar_lea.vmem %s2900_s14, 1792  ;;  %p2902_p12 = scmp.lt.s32.totalorder %s3190_s5, %s2900_s14 }
  0x6c   : > { %p2897_p3 = pnand %p2895_p10, %p2881_p9  ;;  %p2903_p2 = scmp.lt.s32.totalorder %s2901_s20, %s2894_s12 }
  0x6e   : > { %p2898_p7 = pneg %p2897_p3  ;;  %p2904_p1 = por %p2903_p2, %p2902_p12 }
  0x70   : > { %p2905_p4 = pnand %p2904_p1, %p2898_p7 }
  0x72   : > { %2908 = shalt.err (!%p2905_p4)
}
  0x73   : > { %s2991_s29 = smov 448   ;;  %s2992_s7 = smov 28  }
  0x74   : > { %2720 = dma.hbm_to_vmem [thread:$0]  (!%p3186_p11), %s3184_s24, 896, %s3190_s5, %s3192_s6, %s2991_s29, %s2991_s29, %s2992_s7  }
  0x75   : > { %p3584_p9 = scmp.ne.s32.totalorder %s3578_s23, 0 }
  0x76   : > { %s3223_s28 = sand.u32 (!%p3584_p9), 1, %s2975_s16   ;;  %p3585_p0 = scmp.ne.s32.totalorder (!%p3584_p9), %s3576_s21, 0 }
  0x77   : > { %213 = sbr.rel (%p3584_p9) target bundleno = 634 (0x27a), region = 36  ;;  %s216_s9 = scalar_lea.sflag (!%p3584_p9), [#allocation3], %s3223_s28 }
  0x78   : > { %s2688_s8 = smul.u32 (!%p3584_p9), 56, %s3223_s28 }
  0x7a   : > { %s219_s26 = scalar_lea.vmem (!%p3584_p9), [#allocation2], %s2688_s8 }
  0x7e   : > { %2954 = dma.done.wait (%p3585_p0), %s216_s9, 896  }
  0x7f   : > { %2956 = vsyncadd (%p3585_p0), %s216_s9, 4294966400  ;;  %p3586_p8 = scmp.eq.s32.totalorder %s3051_s19, 0 }
  0x81   : > { %2958 = dma.done.wait (%p3586_p8), [#allocation6], 704   ;;  %p3587_p11 = pmov %p3586_p8 }
  0x82   : > { %p3588_p13 = pmov %p3586_p8 }
  0x83   : > { %2960 = vsyncadd (%p3587_p11), [#allocation6], 4294966592 }
  0x84   : > { %2962 = dma.done.wait (%p3588_p13), [#allocation9], 128   ;;  %p3589_p6 = pmov %p3586_p8 }
  0x85   : > { %v2993_v0 = vmov 0   ;;  %v3243_v1 = vld [vmem:[%s219_s26 + $0x8] ss:$28 sps:$4 sm:$0x3f]   ;;  %s2994_s21 = smov 127   ;;  %s2995_s23 = smov 126  }
  0x86   : > { %2964 = vsyncadd (%p3589_p6), [#allocation9], 4294967168  ;;  %378 = vmatprep.mubr.bf16.mxu0 %v2993_v0  ;;  %419 = vmatprep.mubr.bf16.mxu1 %v2993_v0  ;;  %v3245_v2 = vld [vmem:[%s219_s26] ss:$28 sps:$4 sm:$0x3f]   ;;  %s2996_s24 = smov 118  }
  0x87   : > { %2783 = vset.pattern.permute.xlu0 %v2993_v0  ;;  %2784 = vset.pattern.permute.xlu1 %v2993_v0  ;;  %v3248_v3 = vld [vmem:[%s219_s26 + $0xc] ss:$28 sps:$4 sm:$0x3f]   ;;  %v3251_v4 = vld [vmem:[%s219_s26 + $0x4] ss:$28 sps:$4 sm:$0x3f]  }
  0x88   : > { %303 = vrot.lane.b32.xlu1 %v3243_v1, %s2994_s21  ;;  %299 = vrot.lane.b32.xlu0 %v3245_v2, %s2994_s21  ;;  %v3254_v5 = vld [vmem:[%s219_s26 + $0x14] ss:$28 sps:$4 sm:$0x3f]   ;;  %s2997_s27 = smov 117   ;;  %s2998_s5 = smov 116   ;;  %vm313_vm0 = vcmask 1039360  }
  0x89   : > { %v3257_v6 = vld [vmem:[%s219_s26 + $0x10] ss:$28 sps:$4 sm:$0x3f]   ;;  %v3261_v7 = vld [vmem:[%s219_s26 + $0x18] ss:$28 sps:$4 sm:$0x3f]  }
  0x8a   : > { %s2999_s6 = smov 108   ;;  %s3000_s13 = smov 107   ;;  %vm324_vm1 = vcmask 1045504   ;;  %v269_v16 = vld [vmem:[#allocation5 + $0x4] sm:$0xf]  ;;  %vm320_vm2 = vcmask 97280  }
  0x8b   : > { %s3001_s12 = smov 106   ;;  %v3002_v24 = vmov 0.0   ;;  %vm3003_vm3 = vmmov 0   ;;  %v513_v29 = vsel %vm324_vm1, %v3245_v2, 0  ;;  %v519_v32 = vsel %vm324_vm1, %v3243_v1, 0  ;;  %v265_v34 = vld [vmem:[#allocation7] sm:$0xff] }
  0x8c   : > { %305 = vrot.lane.b32.xlu1 %v3248_v3, %s2994_s21  ;;  %301 = vrot.lane.b32.xlu0 %v3251_v4, %s2994_s21  ;;  %vm712_vm4 = vcmask 1031168   ;;  %v266_v35 = vld [vmem:[#allocation8] sm:$0xff]  ;;  %v267_v36 = vld [vmem:[#allocation5] sm:$0xf]  ;;  %v525_v38 = vsel %vm324_vm1, %v3257_v6, 0  ;;  %v531_v42 = vsel %vm324_vm1, %v3261_v7, 0 }
  0x8d   : > { %vm929_vm5 = vcmask 965632   ;;  %v697_v55 = vld [vmem:[#allocation5 + $0x8] sm:$0xf]  ;;  %vm1146_vm6 = vcmask 957440   ;;  %vm1363_vm7 = vcmask 949248   ;;  %vm1580_vm8 = vcmask 883712  }
  0x8e   : > { %vm1797_vm9 = vcmask 875520   ;;  %vm2014_vm10 = vcmask 867328   ;;  %s2689_s30 = smul.u32 28, %s3223_s28  ;;  %vm2278_vm11 = vcmask 257024   ;;  %s2281_s26 = scalar_lea.sflag [#allocation4], %s3223_s28 }
  0x8f   : > { %s2690_s20 = smul.u32 448, %s3051_s19  ;;  %s3004_s19 = smov [#allocation10]  }
  0x90   : > { %309 = vrot.lane.b32.xlu1 %v3254_v5, %s2994_s21  ;;  %307 = vrot.lane.b32.xlu0 %v3257_v6, %s2994_s21  ;;  %s255_s14 = scalar_lea.vmem [#allocation10], %s2689_s30 }
  0x91   : > { %s2295_s29 = sshll.u32 %s255_s14, 4  ;;  %s3524_s9 = scalar_lea.hbm %s3572_s4, %s2690_s20  ;;  %s3526_s29 = int_to_ptr.vmem [resolvable:$true] %s2295_s29 }
  0x94   : > { %698 = vrot.lane.b32.xlu1 %v3245_v2, %s2995_s23  ;;  %311 = vrot.lane.b32.xlu0 %v3261_v7, %s2994_s21  ;;  %s2909_s21 = scalar_lea.vmem %s3526_s29, 448 }
  0x95   : > { %p2910_p10 = scmp.ne.s32.totalorder %s3526_s29, %s2909_s21 }
  0x97   : > { %p2911_p3 = pnand %p2910_p10, %p3175_p5 }
  0x98   : > { %702 = vrot.lane.b32.xlu1 %v3243_v1, %s2995_s23  ;;  %700 = vrot.lane.b32.xlu0 %v3251_v4, %s2995_s23 }
  0x99   : > { %p2912_p7 = pneg %p2911_p3 }
  0x9c   : > { %706 = vrot.lane.b32.xlu1 %v3257_v6, %s2995_s23  ;;  %704 = vrot.lane.b32.xlu0 %v3248_v3, %s2995_s23 }
  0xa0   : > { %710 = vrot.lane.b32.xlu1 %v3261_v7, %s2995_s23  ;;  %708 = vrot.lane.b32.xlu0 %v3254_v5, %s2995_s23  ;;  %s2913_s23 = sshll.u32 %s3004_s19, 4  ;;  %s2914_s23 = int_to_ptr.vmem [resolvable:$false] %s2913_s23 }
  0xa1   : > { %p2916_p12 = scmp.lt.s32.totalorder %s3526_s29, %s2914_s23 }
  0xa4   : > { %917 = vrot.lane.b32.xlu1 %v3251_v4, %s2996_s24  ;;  %915 = vrot.lane.b32.xlu0 %v3245_v2, %s2996_s24 }
  0xa8   : > { %921 = vrot.lane.b32.xlu1 %v3248_v3, %s2996_s24  ;;  %919 = vrot.lane.b32.xlu0 %v3243_v1, %s2996_s24 }
  0xac   : > { %925 = vrot.lane.b32.xlu1 %v3254_v5, %s2996_s24  ;;  %923 = vrot.lane.b32.xlu0 %v3257_v6, %s2996_s24 }
  0xb0   : > { %1132 = vrot.lane.b32.xlu1 %v3245_v2, %s2997_s27  ;;  %927 = vrot.lane.b32.xlu0 %v3261_v7, %s2996_s24  ;;  %s2915_s24 = scalar_lea.vmem %s2914_s23, 896 }
  0xb1   : > { %p2917_p2 = scmp.lt.s32.totalorder %s2915_s24, %s2909_s21 }
  0xb3   : > { %p2918_p1 = por %p2917_p2, %p2916_p12 }
  0xb4   : > { %1136 = vrot.lane.b32.xlu1 %v3243_v1, %s2997_s27  ;;  %1134 = vrot.lane.b32.xlu0 %v3251_v4, %s2997_s27 }
  0xb5   : > { %p2919_p4 = pnand %p2918_p1, %p2912_p7 }
  0xb8   : > { %1140 = vrot.lane.b32.xlu1 %v3257_v6, %s2997_s27  ;;  %1138 = vrot.lane.b32.xlu0 %v3248_v3, %s2997_s27 }
  0xbc   : > { %1144 = vrot.lane.b32.xlu1 %v3261_v7, %s2997_s27  ;;  %1142 = vrot.lane.b32.xlu0 %v3254_v5, %s2997_s27 }
  0xc0   : > { %1351 = vrot.lane.b32.xlu1 %v3251_v4, %s2998_s5  ;;  %1349 = vrot.lane.b32.xlu0 %v3245_v2, %s2998_s5 }
  0xc4   : > { %1355 = vrot.lane.b32.xlu1 %v3248_v3, %s2998_s5  ;;  %1353 = vrot.lane.b32.xlu0 %v3243_v1, %s2998_s5 }
  0xc8   : > { %1359 = vrot.lane.b32.xlu1 %v3254_v5, %s2998_s5  ;;  %1357 = vrot.lane.b32.xlu0 %v3257_v6, %s2998_s5 }
  0xcc   : > { %1566 = vrot.lane.b32.xlu1 %v3245_v2, %s2999_s6  ;;  %1361 = vrot.lane.b32.xlu0 %v3261_v7, %s2998_s5 }
  0xd0   : > { %1570 = vrot.lane.b32.xlu1 %v3243_v1, %s2999_s6  ;;  %1568 = vrot.lane.b32.xlu0 %v3251_v4, %s2999_s6 }
  0xd4   : > { %1574 = vrot.lane.b32.xlu1 %v3257_v6, %s2999_s6  ;;  %1572 = vrot.lane.b32.xlu0 %v3248_v3, %s2999_s6 }
  0xd8   : > { %1578 = vrot.lane.b32.xlu1 %v3261_v7, %s2999_s6  ;;  %1576 = vrot.lane.b32.xlu0 %v3254_v5, %s2999_s6 }
  0xdc   : > { %1785 = vrot.lane.b32.xlu1 %v3251_v4, %s3000_s13  ;;  %1783 = vrot.lane.b32.xlu0 %v3245_v2, %s3000_s13 }
  0xe0   : > { %1789 = vrot.lane.b32.xlu1 %v3248_v3, %s3000_s13  ;;  %1787 = vrot.lane.b32.xlu0 %v3243_v1, %s3000_s13 }
  0xe4   : > { %1793 = vrot.lane.b32.xlu1 %v3254_v5, %s3000_s13  ;;  %1791 = vrot.lane.b32.xlu0 %v3257_v6, %s3000_s13 }
  0xe8   : > { %2000 = vrot.lane.b32.xlu1 %v3245_v2, %s3001_s12  ;;  %1795 = vrot.lane.b32.xlu0 %v3261_v7, %s3000_s13 }
  0xec   : > { %2004 = vrot.lane.b32.xlu1 %v3243_v1, %s3001_s12  ;;  %2002 = vrot.lane.b32.xlu0 %v3251_v4, %s3001_s12 }
  0xf0   : > { %2008 = vrot.lane.b32.xlu1 %v3257_v6, %s3001_s12  ;;  %2006 = vrot.lane.b32.xlu0 %v3248_v3, %s3001_s12 }
  0xf4   : > { %2012 = vrot.lane.b32.xlu1 %v3261_v7, %s3001_s12  ;;  %2010 = vrot.lane.b32.xlu0 %v3254_v5, %s3001_s12 }
  0xf8   : > { %2217 = vperm.xlu0 %2783, %v265_v34   ;;  %2229 = vperm.xlu1 %2784, %v266_v35  }
  0xfa   : > { %v304_v8 = vpop.permute.xlu1 %303  ;;  %v300_v9 = vpop.permute.xlu0 %299 }
  0xfe   : > { %v306_v10 = vpop.permute.xlu1 %305  ;;  %v302_v11 = vpop.permute.xlu0 %301 }
  0xff   : > { %v315_v12 = vsel %vm313_vm0, %v302_v11, %v304_v8  ;;  %v314_v13 = vsel %vm313_vm0, %v300_v9, %v302_v11  ;;  %v316_v17 = vsel %vm313_vm0, %v304_v8, %v306_v10  ;;  %v914_v11 = vld [vmem:[#allocation5 + $0xc] sm:$0xf] }
 0x100   : > { %2412 = vmatprep.subr.msk.bf16.mxu0 %vm324_vm1, %v315_v12  ;;  %v326_v14 = vsel %vm324_vm1, %v314_v13, 0  ;;  %v332_v20 = vsel %vm324_vm1, %v316_v17, 0 }
 0x101   : > { %347 = vmatpush1.bf16.msra.mxu0 %v326_v14 }
 0x102   : > { %v310_v15 = vpop.permute.xlu1 %309  ;;  %v308_v18 = vpop.permute.xlu0 %307 }
 0x103   : > { %v317_v19 = vsel %vm313_vm0, %v306_v10, %v308_v18  ;;  %v318_v21 = vsel %vm313_vm0, %v308_v18, %v310_v15 }
 0x104   : > { %2413 = vmatmul.mubr.msk.bf16.vlgmr.msra.gmra.mrb[0].mxu0 %vm320_vm2, %v269_v16  ;;  %2414 = vmatprep.subr.msk.bf16.mxu1 %vm324_vm1, %v317_v19  ;;  %v338_v27 = vsel %vm324_vm1, %v318_v21, 0 }
 0x105   : > { %388 = vmatpush1.bf16.msra.mxu1 %v332_v20  ;;  %460 = vmatprep.mubr.bf16.mxu0 %v2993_v0 }
 0x106   : > { %v699_v22 = vpop.permute.xlu1 %698  ;;  %v312_v23 = vpop.permute.xlu0 %311  ;;  %2504 = vmatprep.subr.bf16.mxu1 %v3002_v24 }
 0x107   : > { %v319_v25 = vsel %vm313_vm0, %v310_v15, %v312_v23  ;;  %v344_v26 = vsel %vm324_vm1, %v312_v23, 0 }
 0x108   : > { %2415 = vmatmul.mubr.msk.bf16.vlgmr.msra.gmra.mrb[0].mxu1 %vm320_vm2, %v269_v16  ;;  %2416 = vmatprep.subr.msk.bf16.mxu0 %vm324_vm1, %v319_v25 }
 0x109   : > { %429 = vmatpush1.bf16.msra.mxu0 %v338_v27  ;;  %2505 = vmatpush3.bf16.msra.mxu1 %v344_v26 }
 0x10a   : > { %v703_v28 = vpop.permute.xlu1 %702  ;;  %2506 = vmatprep.mubr.msk.bf16.mxu1 %vm3003_vm3, %v3002_v24  ;;  %2419 = vmatprep.subr.msk.bf16.mxu0 %vm324_vm1, %v3251_v4  ;;  %v701_v30 = vpop.permute.xlu0 %700 }
 0x10b   : > { %2421 = vmatprep.subr.msk.bf16.mxu1 %vm324_vm1, %v3248_v3  ;;  %v714_v40 = vsel %vm712_vm4, %v701_v30, %v703_v28  ;;  %v713_v44 = vsel %vm712_vm4, %v699_v22, %v701_v30 }
 0x10c   : > { %2417 = vmatmul.mubr.msk.bf16.vlgmr.msra.gmra.mrb[4].mxu0 %vm320_vm2, %v269_v16  ;;  %v723_v47 = vsel %vm324_vm1, %v713_v44, 0 }
 0x10d   : > { %534 = vmatpush1.bf16.msra.mxu0 %v513_v29  ;;  %565 = vmatprep.mubr.bf16.mxu0 %v2993_v0 }
 0x10e   : > { %v707_v31 = vpop.permute.xlu1 %706  ;;  %2423 = vmatprep.subr.msk.bf16.mxu0 %vm324_vm1, %v3254_v5  ;;  %v705_v33 = vpop.permute.xlu0 %704 }
 0x10f   : > { %v716_v45 = vsel %vm712_vm4, %v705_v33, %v707_v31  ;;  %v715_v49 = vsel %vm712_vm4, %v703_v28, %v705_v33 }
 0x110   : > { %2507 = vmatmul.mubr.msk.bf16.vlgmr.msra.gmra.mrb[4].mxu1 %vm320_vm2, %v269_v16  ;;  %v729_v52 = vsel %vm324_vm1, %v715_v49, 0 }
 0x111   : > { %575 = vmatpush1.bf16.msra.mxu1 %v519_v32  ;;  %606 = vmatprep.mubr.bf16.mxu1 %v2993_v0 }
 0x112   : > { %v711_v37 = vpop.permute.xlu1 %710  ;;  %2510 = vmatprep.subr.bf16.mxu1 %v3002_v24  ;;  %v709_v39 = vpop.permute.xlu0 %708 }
 0x113   : > { %v718_v50 = vsel %vm712_vm4, %v709_v39, %v711_v37  ;;  %v717_v54 = vsel %vm712_vm4, %v707_v31, %v709_v39  ;;  %v741_v61 = vsel %vm324_vm1, %v711_v37, 0  ;;  %v1131_v31 = vld [vmem:[#allocation5 + $0x10] sm:$0xf] }
 0x114   : > { %2420 = vmatmul.mubr.msk.bf16.vlgmr.msra.gmra.mrb[0].mxu0 %vm320_vm2, %v267_v36  ;;  %v735_v57 = vsel %vm324_vm1, %v717_v54, 0 }
 0x115   : > { %616 = vmatpush1.bf16.msra.mxu0 %v525_v38  ;;  %647 = vmatprep.mubr.bf16.mxu0 %v2993_v0 }
 0x116   : > { %v918_v41 = vpop.permute.xlu1 %917  ;;  %2426 = vmatprep.subr.msk.bf16.mxu0 %vm324_vm1, %v714_v40  ;;  %v916_v43 = vpop.permute.xlu0 %915 }
 0x117   : > { %v930_v63 = vsel %vm929_vm5, %v916_v43, %v918_v41 }
 0x118   : > { %2422 = vmatmul.mubr.msk.bf16.vlgmr.msra.gmra.mrb[0].mxu1 %vm320_vm2, %v267_v36  ;;  %v940_v3 = vsel %vm324_vm1, %v930_v63, 0 }
 0x119   : > { %2511 = vmatpush3.bf16.msra.mxu1 %v531_v42  ;;  %2512 = vmatprep.mubr.msk.bf16.mxu1 %vm3003_vm3, %v3002_v24 }
 0x11a   : > { %v922_v46 = vpop.permute.xlu1 %921  ;;  %2428 = vmatprep.subr.msk.bf16.mxu1 %vm324_vm1, %v716_v45  ;;  %v920_v48 = vpop.permute.xlu0 %919 }
 0x11b   : > { %v931_v59 = vsel %vm929_vm5, %v918_v41, %v920_v48  ;;  %v932_v5 = vsel %vm929_vm5, %v920_v48, %v922_v46  ;;  %v1348_v48 = vld [vmem:[#allocation5 + $0x14] sm:$0xf] }
 0x11c   : > { %2424 = vmatmul.mubr.msk.bf16.vlgmr.msra.gmra.mrb[4].mxu0 %vm320_vm2, %v267_v36  ;;  %v946_v8 = vsel %vm324_vm1, %v932_v5, 0 }
 0x11d   : > { %744 = vmatpush1.bf16.msra.mxu0 %v723_v47  ;;  %775 = vmatprep.mubr.bf16.mxu0 %v2993_v0 }
 0x11e   : > { %v926_v51 = vpop.permute.xlu1 %925  ;;  %2430 = vmatprep.subr.msk.bf16.mxu0 %vm324_vm1, %v718_v50  ;;  %v924_v53 = vpop.permute.xlu0 %923 }
 0x11f   : > { %v933_v1 = vsel %vm929_vm5, %v922_v46, %v924_v53  ;;  %v934_v10 = vsel %vm929_vm5, %v924_v53, %v926_v51 }
 0x120   : > { %2513 = vmatmul.mubr.msk.bf16.vlgmr.msra.gmra.mrb[4].mxu1 %vm320_vm2, %v267_v36  ;;  %v952_v13 = vsel %vm324_vm1, %v934_v10, 0 }
 0x121   : > { %785 = vmatpush1.bf16.msra.mxu1 %v729_v52  ;;  %816 = vmatprep.mubr.bf16.mxu1 %v2993_v0 }
 0x122   : > { %v1133_v56 = vpop.permute.xlu1 %1132  ;;  %2516 = vmatprep.subr.bf16.mxu1 %v3002_v24  ;;  %v928_v58 = vpop.permute.xlu0 %927 }
 0x123   : > { %v935_v6 = vsel %vm929_vm5, %v926_v51, %v928_v58  ;;  %v958_v17 = vsel %vm324_vm1, %v928_v58, 0 }
 0x124   : > { %2427 = vmatmul.mubr.msk.bf16.vlgmr.msra.gmra.mrb[0].mxu0 %vm320_vm2, %v697_v55 }
 0x125   : > { %826 = vmatpush1.bf16.msra.mxu0 %v735_v57  ;;  %857 = vmatprep.mubr.bf16.mxu0 %v2993_v0 }
 0x126   : > { %v1137_v60 = vpop.permute.xlu1 %1136  ;;  %2433 = vmatprep.subr.msk.bf16.mxu0 %vm324_vm1, %v931_v59  ;;  %v1135_v62 = vpop.permute.xlu0 %1134 }
 0x127   : > { %v1148_v15 = vsel %vm1146_vm6, %v1135_v62, %v1137_v60  ;;  %v1147_v19 = vsel %vm1146_vm6, %v1133_v56, %v1135_v62 }
 0x128   : > { %2429 = vmatmul.mubr.msk.bf16.vlgmr.msra.gmra.mrb[0].mxu1 %vm320_vm2, %v697_v55  ;;  %v1157_v22 = vsel %vm324_vm1, %v1147_v19, 0 }
 0x129   : > { %2517 = vmatpush3.bf16.msra.mxu1 %v741_v61  ;;  %2518 = vmatprep.mubr.msk.bf16.mxu1 %vm3003_vm3, %v3002_v24 }
 0x12a   : > { %v1141_v2 = vpop.permute.xlu1 %1140  ;;  %2435 = vmatprep.subr.msk.bf16.mxu1 %vm324_vm1, %v933_v1  ;;  %v1139_v4 = vpop.permute.xlu0 %1138  ;;  %v1565_v1 = vld [vmem:[#allocation5 + $0x18] sm:$0xf] }
 0x12b   : > { %v1150_v20 = vsel %vm1146_vm6, %v1139_v4, %v1141_v2  ;;  %v1149_v25 = vsel %vm1146_vm6, %v1137_v60, %v1139_v4 }
 0x12c   : > { %2431 = vmatmul.mubr.msk.bf16.vlgmr.msra.gmra.mrb[4].mxu0 %vm320_vm2, %v697_v55  ;;  %v1163_v27 = vsel %vm324_vm1, %v1149_v25, 0 }
 0x12d   : > { %961 = vmatpush1.bf16.msra.mxu0 %v940_v3  ;;  %992 = vmatprep.mubr.bf16.mxu0 %v2993_v0 }
 0x12e   : > { %v1145_v7 = vpop.permute.xlu1 %1144  ;;  %2437 = vmatprep.subr.msk.bf16.mxu0 %vm324_vm1, %v935_v6  ;;  %v1143_v9 = vpop.permute.xlu0 %1142 }
 0x12f   : > { %v1152_v26 = vsel %vm1146_vm6, %v1143_v9, %v1145_v7  ;;  %v1151_v29 = vsel %vm1146_vm6, %v1141_v2, %v1143_v9  ;;  %v1175_v36 = vsel %vm324_vm1, %v1145_v7, 0 }
 0x130   : > { %2519 = vmatmul.mubr.msk.bf16.vlgmr.msra.gmra.mrb[4].mxu1 %vm320_vm2, %v697_v55  ;;  %v1169_v32 = vsel %vm324_vm1, %v1151_v29, 0 }
 0x131   : > { %1002 = vmatpush1.bf16.msra.mxu1 %v946_v8  ;;  %1033 = vmatprep.mubr.bf16.mxu1 %v2993_v0 }
 0x132   : > { %v1352_v12 = vpop.permute.xlu1 %1351  ;;  %2522 = vmatprep.subr.bf16.mxu1 %v3002_v24  ;;  %v1350_v14 = vpop.permute.xlu0 %1349 }
 0x133   : > { %v1364_v37 = vsel %vm1363_vm7, %v1350_v14, %v1352_v12 }
 0x134   : > { %2434 = vmatmul.mubr.msk.bf16.vlgmr.msra.gmra.mrb[0].mxu0 %vm320_vm2, %v914_v11  ;;  %v1374_v39 = vsel %vm324_vm1, %v1364_v37, 0 }
 0x135   : > { %1043 = vmatpush1.bf16.msra.mxu0 %v952_v13  ;;  %1074 = vmatprep.mubr.bf16.mxu0 %v2993_v0 }
 0x136   : > { %v1356_v16 = vpop.permute.xlu1 %1355  ;;  %2440 = vmatprep.subr.msk.bf16.mxu0 %vm324_vm1, %v1148_v15  ;;  %v1354_v18 = vpop.permute.xlu0 %1353 }
 0x137   : > { %v1365_v33 = vsel %vm1363_vm7, %v1352_v12, %v1354_v18  ;;  %v1366_v42 = vsel %vm1363_vm7, %v1354_v18, %v1356_v16 }
 0x138   : > { %2436 = vmatmul.mubr.msk.bf16.vlgmr.msra.gmra.mrb[0].mxu1 %vm320_vm2, %v914_v11  ;;  %v1380_v44 = vsel %vm324_vm1, %v1366_v42, 0 }
 0x139   : > { %2523 = vmatpush3.bf16.msra.mxu1 %v958_v17  ;;  %2524 = vmatprep.mubr.msk.bf16.mxu1 %vm3003_vm3, %v3002_v24  ;;  %v1782_v17 = vld [vmem:[#allocation5 + $0x1c] sm:$0xf] }
 0x13a   : > { %v1360_v21 = vpop.permute.xlu1 %1359  ;;  %2442 = vmatprep.subr.msk.bf16.mxu1 %vm324_vm1, %v1150_v20  ;;  %v1358_v23 = vpop.permute.xlu0 %1357 }
 0x13b   : > { %v1367_v38 = vsel %vm1363_vm7, %v1356_v16, %v1358_v23  ;;  %v1368_v45 = vsel %vm1363_vm7, %v1358_v23, %v1360_v21 }
 0x13c   : > { %2438 = vmatmul.mubr.msk.bf16.vlgmr.msra.gmra.mrb[4].mxu0 %vm320_vm2, %v914_v11  ;;  %v1386_v49 = vsel %vm324_vm1, %v1368_v45, 0 }
 0x13d   : > { %1178 = vmatpush1.bf16.msra.mxu0 %v1157_v22  ;;  %1209 = vmatprep.mubr.bf16.mxu0 %v2993_v0 }
 0x13e   : > { %2444 = vmatprep.subr.msk.bf16.mxu0 %vm324_vm1, %v1152_v26  ;;  %v1567_v28 = vpop.permute.xlu1 %1566  ;;  %v1362_v30 = vpop.permute.xlu0 %1361 }
 0x13f   : > { %v1369_v43 = vsel %vm1363_vm7, %v1360_v21, %v1362_v30  ;;  %v1392_v52 = vsel %vm324_vm1, %v1362_v30, 0 }
 0x140   : > { %2525 = vmatmul.mubr.msk.bf16.vlgmr.msra.gmra.mrb[4].mxu1 %vm320_vm2, %v914_v11 }
 0x141   : > { %1219 = vmatpush1.bf16.msra.mxu1 %v1163_v27  ;;  %1250 = vmatprep.mubr.bf16.mxu1 %v2993_v0 }
 0x142   : > { %2528 = vmatprep.subr.bf16.mxu1 %v3002_v24  ;;  %v1569_v34 = vpop.permute.xlu0 %1568  ;;  %v1571_v35 = vpop.permute.xlu1 %1570 }
 0x143   : > { %v1582_v50 = vsel %vm1580_vm8, %v1569_v34, %v1571_v35  ;;  %v1581_v54 = vsel %vm1580_vm8, %v1567_v28, %v1569_v34 }
 0x144   : > { %2441 = vmatmul.mubr.msk.bf16.vlgmr.msra.gmra.mrb[0].mxu0 %vm320_vm2, %v1131_v31  ;;  %v1591_v56 = vsel %vm324_vm1, %v1581_v54, 0 }
 0x145   : > { %1260 = vmatpush1.bf16.msra.mxu0 %v1169_v32  ;;  %1291 = vmatprep.mubr.bf16.mxu0 %v2993_v0 }
 0x146   : > { %2447 = vmatprep.subr.msk.bf16.mxu0 %vm324_vm1, %v1365_v33  ;;  %v1573_v40 = vpop.permute.xlu0 %1572  ;;  %v1575_v41 = vpop.permute.xlu1 %1574  ;;  %v1999_v33 = vld [vmem:[#allocation5 + $0x20] sm:$0xf] }
 0x147   : > { %v1584_v55 = vsel %vm1580_vm8, %v1573_v40, %v1575_v41  ;;  %v1583_v58 = vsel %vm1580_vm8, %v1571_v35, %v1573_v40 }
 0x148   : > { %2443 = vmatmul.mubr.msk.bf16.vlgmr.msra.gmra.mrb[0].mxu1 %vm320_vm2, %v1131_v31  ;;  %v1597_v61 = vsel %vm324_vm1, %v1583_v58, 0 }
 0x149   : > { %2529 = vmatpush3.bf16.msra.mxu1 %v1175_v36  ;;  %2530 = vmatprep.mubr.msk.bf16.mxu1 %vm3003_vm3, %v3002_v24 }
 0x14a   : > { %2449 = vmatprep.subr.msk.bf16.mxu1 %vm324_vm1, %v1367_v38  ;;  %v1577_v46 = vpop.permute.xlu0 %1576  ;;  %v1579_v47 = vpop.permute.xlu1 %1578 }
 0x14b   : > { %v1586_v59 = vsel %vm1580_vm8, %v1577_v46, %v1579_v47  ;;  %v1585_v62 = vsel %vm1580_vm8, %v1575_v41, %v1577_v46  ;;  %v1609_v5 = vsel %vm324_vm1, %v1579_v47, 0 }
 0x14c   : > { %2445 = vmatmul.mubr.msk.bf16.vlgmr.msra.gmra.mrb[4].mxu0 %vm320_vm2, %v1131_v31  ;;  %v1603_v2 = vsel %vm324_vm1, %v1585_v62, 0 }
 0x14d   : > { %1395 = vmatpush1.bf16.msra.mxu0 %v1374_v39  ;;  %1426 = vmatprep.mubr.bf16.mxu0 %v2993_v0 }
 0x14e   : > { %2451 = vmatprep.subr.msk.bf16.mxu0 %vm324_vm1, %v1369_v43  ;;  %v1786_v51 = vpop.permute.xlu1 %1785  ;;  %v1784_v53 = vpop.permute.xlu0 %1783 }
 0x14f   : > { %v1798_v7 = vsel %vm1797_vm9, %v1784_v53, %v1786_v51 }
 0x150   : > { %2531 = vmatmul.mubr.msk.bf16.vlgmr.msra.gmra.mrb[4].mxu1 %vm320_vm2, %v1131_v31  ;;  %v1808_v10 = vsel %vm324_vm1, %v1798_v7, 0 }
 0x151   : > { %1436 = vmatpush1.bf16.msra.mxu1 %v1380_v44  ;;  %1467 = vmatprep.mubr.bf16.mxu1 %v2993_v0 }
 0x152   : > { %2534 = vmatprep.subr.bf16.mxu1 %v3002_v24  ;;  %v1790_v57 = vpop.permute.xlu1 %1789  ;;  %v1788_v60 = vpop.permute.xlu0 %1787 }
 0x153   : > { %v1799_v4 = vsel %vm1797_vm9, %v1786_v51, %v1788_v60  ;;  %v1800_v11 = vsel %vm1797_vm9, %v1788_v60, %v1790_v57 }
 0x154   : > { %2448 = vmatmul.mubr.msk.bf16.vlgmr.msra.gmra.mrb[0].mxu0 %vm320_vm2, %v1348_v48  ;;  %v1814_v15 = vsel %vm324_vm1, %v1800_v11, 0 }
 0x155   : > { %1477 = vmatpush1.bf16.msra.mxu0 %v1386_v49  ;;  %1508 = vmatprep.mubr.bf16.mxu0 %v2993_v0 }
 0x156   : > { %2454 = vmatprep.subr.msk.bf16.mxu0 %vm324_vm1, %v1582_v50  ;;  %v1794_v63 = vpop.permute.xlu1 %1793  ;;  %v1792_v3 = vpop.permute.xlu0 %1791 }
 0x157   : > { %v1801_v8 = vsel %vm1797_vm9, %v1790_v57, %v1792_v3  ;;  %v1802_v16 = vsel %vm1797_vm9, %v1792_v3, %v1794_v63 }
 0x158   : > { %2450 = vmatmul.mubr.msk.bf16.vlgmr.msra.gmra.mrb[0].mxu1 %vm320_vm2, %v1348_v48  ;;  %v1820_v18 = vsel %vm324_vm1, %v1802_v16, 0 }
 0x159   : > { %2535 = vmatpush3.bf16.msra.mxu1 %v1392_v52  ;;  %2536 = vmatprep.mubr.msk.bf16.mxu1 %vm3003_vm3, %v3002_v24 }
 0x15a   : > { %2456 = vmatprep.subr.msk.bf16.mxu1 %vm324_vm1, %v1584_v55  ;;  %v2001_v6 = vpop.permute.xlu1 %2000  ;;  %v1796_v9 = vpop.permute.xlu0 %1795 }
 0x15b   : > { %v1803_v12 = vsel %vm1797_vm9, %v1794_v63, %v1796_v9  ;;  %v1826_v22 = vsel %vm324_vm1, %v1796_v9, 0 }
 0x15c   : > { %2452 = vmatmul.mubr.msk.bf16.vlgmr.msra.gmra.mrb[4].mxu0 %vm320_vm2, %v1348_v48 }
 0x15d   : > { %1612 = vmatpush1.bf16.msra.mxu0 %v1591_v56  ;;  %1643 = vmatprep.mubr.bf16.mxu0 %v2993_v0 }
 0x15e   : > { %2458 = vmatprep.subr.msk.bf16.mxu0 %vm324_vm1, %v1586_v59  ;;  %v2003_v13 = vpop.permute.xlu0 %2002  ;;  %v2005_v14 = vpop.permute.xlu1 %2004 }
 0x15f   : > { %v2016_v21 = vsel %vm2014_vm10, %v2003_v13, %v2005_v14  ;;  %v2015_v23 = vsel %vm2014_vm10, %v2001_v6, %v2003_v13 }
 0x160   : > { %2537 = vmatmul.mubr.msk.bf16.vlgmr.msra.gmra.mrb[4].mxu1 %vm320_vm2, %v1348_v48  ;;  %v2025_v28 = vsel %vm324_vm1, %v2015_v23, 0 }
 0x161   : > { %1653 = vmatpush1.bf16.msra.mxu1 %v1597_v61  ;;  %1684 = vmatprep.mubr.bf16.mxu1 %v2993_v0 }
 0x162   : > { %2540 = vmatprep.subr.bf16.mxu1 %v3002_v24  ;;  %v2007_v19 = vpop.permute.xlu0 %2006  ;;  %v2009_v20 = vpop.permute.xlu1 %2008 }
 0x163   : > { %v2018_v25 = vsel %vm2014_vm10, %v2007_v19, %v2009_v20  ;;  %v2017_v29 = vsel %vm2014_vm10, %v2005_v14, %v2007_v19 }
 0x164   : > { %2455 = vmatmul.mubr.msk.bf16.vlgmr.msra.gmra.mrb[0].mxu0 %vm320_vm2, %v1565_v1  ;;  %v2031_v31 = vsel %vm324_vm1, %v2017_v29, 0 }
 0x165   : > { %1694 = vmatpush1.bf16.msra.mxu0 %v1603_v2  ;;  %1725 = vmatprep.mubr.bf16.mxu0 %v2993_v0 }
 0x166   : > { %2461 = vmatprep.subr.msk.bf16.mxu0 %vm324_vm1, %v1799_v4  ;;  %v2011_v26 = vpop.permute.xlu0 %2010  ;;  %v2013_v27 = vpop.permute.xlu1 %2012 }
 0x167   : > { %v2020_v30 = vsel %vm2014_vm10, %v2011_v26, %v2013_v27  ;;  %v2019_v32 = vsel %vm2014_vm10, %v2009_v20, %v2011_v26  ;;  %v2043_v35 = vsel %vm324_vm1, %v2013_v27, 0 }
 0x168   : > { %2457 = vmatmul.mubr.msk.bf16.vlgmr.msra.gmra.mrb[0].mxu1 %vm320_vm2, %v1565_v1  ;;  %v2037_v34 = vsel %vm324_vm1, %v2019_v32, 0 }
 0x169   : > { %2541 = vmatpush3.bf16.msra.mxu1 %v1609_v5  ;;  %2542 = vmatprep.mubr.msk.bf16.mxu1 %vm3003_vm3, %v3002_v24 }
 0x16a   : > { %2463 = vmatprep.subr.msk.bf16.mxu1 %vm324_vm1, %v1801_v8 }
 0x16c   : > { %2459 = vmatmul.mubr.msk.bf16.vlgmr.msra.gmra.mrb[4].mxu0 %vm320_vm2, %v1565_v1 }
 0x16d   : > { %1829 = vmatpush1.bf16.msra.mxu0 %v1808_v10  ;;  %1860 = vmatprep.mubr.bf16.mxu0 %v2993_v0 }
 0x16e   : > { %2465 = vmatprep.subr.msk.bf16.mxu0 %vm324_vm1, %v1803_v12 }
 0x170   : > { %2543 = vmatmul.mubr.msk.bf16.vlgmr.msra.gmra.mrb[4].mxu1 %vm320_vm2, %v1565_v1 }
 0x171   : > { %1870 = vmatpush1.bf16.msra.mxu1 %v1814_v15  ;;  %1901 = vmatprep.mubr.bf16.mxu1 %v2993_v0 }
 0x172   : > { %2546 = vmatprep.subr.bf16.mxu1 %v3002_v24 }
 0x174   : > { %2462 = vmatmul.mubr.msk.bf16.vlgmr.msra.gmra.mrb[0].mxu0 %vm320_vm2, %v1782_v17 }
 0x175   : > { %1911 = vmatpush1.bf16.msra.mxu0 %v1820_v18  ;;  %1942 = vmatprep.mubr.bf16.mxu0 %v2993_v0 }
 0x176   : > { %2468 = vmatprep.subr.msk.bf16.mxu0 %vm324_vm1, %v2016_v21 }
 0x177   : > { %v2218_v36 = vpop.permute.xlu0 %2217  ;;  %v2230_v38 = vpop.permute.xlu1 %2229 }
 0x178   : > { %2464 = vmatmul.mubr.msk.bf16.vlgmr.msra.gmra.mrb[0].mxu1 %vm320_vm2, %v1782_v17 }
 0x179   : > { %2547 = vmatpush3.bf16.msra.mxu1 %v1826_v22  ;;  %2548 = vmatprep.mubr.msk.bf16.mxu1 %vm3003_vm3, %v3002_v24 }
 0x17a   : > { %2470 = vmatprep.subr.msk.bf16.mxu1 %vm324_vm1, %v2018_v25 }
 0x17c   : > { %2466 = vmatmul.mubr.msk.bf16.vlgmr.msra.gmra.mrb[4].mxu0 %vm320_vm2, %v1782_v17 }
 0x17d   : > { %2046 = vmatpush1.bf16.msra.mxu0 %v2025_v28  ;;  %2077 = vmatprep.mubr.bf16.mxu0 %v2993_v0 }
 0x17e   : > { %2472 = vmatprep.subr.msk.bf16.mxu0 %vm324_vm1, %v2020_v30 }
 0x180   : > { %2549 = vmatmul.mubr.msk.bf16.vlgmr.msra.gmra.mrb[4].mxu1 %vm320_vm2, %v1782_v17 }
 0x181   : > { %2087 = vmatpush1.bf16.msra.mxu1 %v2031_v31  ;;  %2118 = vmatprep.mubr.bf16.mxu1 %v2993_v0 }
 0x182   : > { %2552 = vmatprep.subr.bf16.mxu1 %v3002_v24 }
 0x184   : > { %2469 = vmatmul.mubr.msk.bf16.vlgmr.msra.gmra.mrb[0].mxu0 %vm320_vm2, %v1999_v33 }
 0x185   : > { %2128 = vmatpush1.bf16.msra.mxu0 %v2037_v34  ;;  %2159 = vmatprep.mubr.bf16.mxu0 %v2993_v0 }
 0x188   : > { %2471 = vmatmul.mubr.msk.bf16.vlgmr.msra.gmra.mrb[0].mxu1 %vm320_vm2, %v1999_v33 }
 0x189   : > { %2553 = vmatpush3.bf16.msra.mxu1 %v2043_v35  ;;  %2554 = vmatprep.mubr.msk.bf16.mxu1 %vm3003_vm3, %v3002_v24 }
 0x18c   : > { %2473 = vmatmul.mubr.msk.bf16.vlgmr.msra.gmra.mrb[4].mxu0 %vm320_vm2, %v1999_v33 }
 0x190   : > { %2555 = vmatmul.mubr.msk.bf16.vlgmr.msra.gmra.mrb[4].mxu1 %vm320_vm2, %v1999_v33 }
 0x257   : > { %v2079_v37 = vpop.f32.mrb[0].mxu0 }
 0x258   : > { %v2220_v39 = vmul.f32 %v2218_v36, %v2079_v37  ;;  %v2081_v40 = vpop.f32.mrb[1].mxu0 }
 0x259   : > { %v2221_v41 = vmul.f32 %v2218_v36, %v2081_v40  ;;  %v2083_v0 = vpop.f32.mrb[2].mxu0 }
 0x25a   : > { %v2232_v42 = vadd.f32 %v2230_v38, %v2220_v39  ;;  %v2084_v43 = vpop.f32.mrb[3].mxu0 }
 0x25b   : > { %v2233_v44 = vadd.f32 %v2230_v38, %v2221_v41  ;;  %v2120_v45 = vpop.f32.mrb[0].mxu1 }
 0x25c   : > { %v2239_v46 = vmax.f32 %v2232_v42, 0.0  ;;  %v2222_v47 = vmul.f32 %v2218_v36, %v2120_v45  ;;  %v2122_v48 = vpop.f32.mrb[1].mxu1 }
 0x25d   : > { %v2240_v24 = vmax.f32 %v2233_v44, 0.0  ;;  %v2223_v49 = vmul.f32 %v2218_v36, %v2122_v48  ;;  %v2124_v50 = vpop.f32.mrb[2].mxu1 }
 0x25e   : > { %v2234_v51 = vadd.f32 %v2230_v38, %v2222_v47  ;;  %v2125_v52 = vpop.f32.mrb[3].mxu1 }
 0x25f   : > { %v2482_v53 = vpack.c.bf16 %v2240_v24, %v2239_v46  ;;  %v2235_v54 = vadd.f32 %v2230_v38, %v2223_v49  ;;  %v2161_v55 = vpop.f32.mrb[4].mxu0 }
 0x260   : > { %v2241_v56 = vmax.f32 %v2234_v51, 0.0  ;;  %v2224_v57 = vmul.f32 %v2218_v36, %v2161_v55  ;;  %v2163_v58 = vpop.f32.mrb[5].mxu0 }
 0x261   : > { %v2242_v59 = vmax.f32 %v2235_v54, 0.0  ;;  %2275 = vst [vmem:[%s255_s14] sm:$0xff] %v2482_v53  ;;  %v2225_v60 = vmul.f32 %v2218_v36, %v2163_v58  ;;  %v2165_v61 = vpop.f32.mrb[6].mxu0 }
 0x262   : > { %v2236_v62 = vadd.f32 %v2230_v38, %v2224_v57  ;;  %v2166_v63 = vpop.f32.mrb[7].mxu0 }
 0x263   : > { %v2483_v1 = vpack.c.bf16 %v2242_v59, %v2241_v56  ;;  %v2237_v2 = vadd.f32 %v2230_v38, %v2225_v60  ;;  %v2202_v3 = vpop.f32.mrb[4].mxu1 }
 0x264   : > { %v2243_v4 = vmax.f32 %v2236_v62, 0.0  ;;  %v2226_v5 = vmul.f32 %v2218_v36, %v2202_v3  ;;  %v2556_v6 = vpop.f32.mrb[5].mxu1 }
 0x265   : > { %2276 = vst [vmem:[%s255_s14 + $0x8] sm:$0xff] %v2483_v1  ;;  %v2244_v7 = vmax.f32 %v2237_v2, 0.0  ;;  %v2205_v8 = vpop.f32.mrb[6].mxu1 }
 0x266   : > { %v2238_v9 = vadd.f32 %v2230_v38, %v2226_v5  ;;  %v2557_v10 = vpop.f32.mrb[7].mxu1 }
 0x267   : > { %v2484_v11 = vpack.c.bf16 %v2244_v7, %v2243_v4 }
 0x268   : > { %v2245_v12 = vmax.f32 %v2238_v9, 0.0 }
 0x269   : > { %2277 = vst [vmem:[%s255_s14 + $0x10] sm:$0xff] %v2484_v11 }
 0x26a   : > { %v2485_v13 = vpack.c.bf16 %v2245_v12, %v2245_v12 }
 0x26c   : > { %2279 = vst.msk [vmem:[%s255_s14 + $0x18] sm:$0xf] %vm2278_vm11, %v2485_v13 }
 0x26d   : > { %2922 = shalt.err (!%p2919_p4)
}
 0x26e   : > { %s2923_s28 = scalar_lea.hbm %s3524_s9, 448  ;;  %s2927_s6 = scalar_lea.hbm %s3572_s4, 896 }
 0x26f   : > { %p2924_p9 = scmp.ne.s32.totalorder %s3524_s9, %s2923_s28  ;;  %p2928_p11 = scmp.lt.u32.totalorder %s3524_s9, %s3572_s4 }
 0x270   : > { %p2929_p13 = scmp.lt.u32.totalorder %s2927_s6, %s2923_s28  ;;  %p2931_p10 = scmp.lt.u32.totalorder %s2923_s28, %s3524_s9 }
 0x271   : > { %p2925_p0 = pnand %p2924_p9, %p3175_p5 }
 0x272   : > { %p2930_p6 = por %p2929_p13, %p2928_p11 }
 0x273   : > { %p2926_p8 = pneg %p2925_p0 }
 0x274   : > { %p2932_p3 = por %p2931_p10, %p2930_p6 }
 0x276   : > { %p2933_p7 = pnand %p2932_p3, %p2926_p8 }
 0x278   : > { %2936 = shalt.err (!%p2933_p7)
}
 0x279   : > { %2705 = dma.vmem_to_hbm [thread:$0]  (%p3175_p5), %s3526_s29, 448, %s3524_s9, %s2281_s26  }
 0x27a PF: > { %s2307_s30 = sand.u32 1, %s2971_s15   ;;  %p3590_p12 = scmp.ne.s32.totalorder %s3577_s22, 0 }
 0x27b   : > { %p3591_p2 = scmp.ge.s32.totalorder %s2983_s18, 2  ;;  %s2308_s14 = scalar_lea.sflag [#allocation4], %s2307_s30 }
 0x27d   : > { %p2722_p1 = pnand %p3591_p2, %p3590_p12 }
 0x27f   : > { %2966 = dma.done.wait (!%p2722_p1), %s2308_s14, 448  }
 0x280   : > { %2968 = vsyncadd (!%p2722_p1), %s2308_s14, 4294966848  ;;  %p19_p4 = scmp.ge.s32.totalorder %s3161_s10, 4   ;;  %s3592_s15 = smov %s2975_s16 }
 0x281   : > { %s3593_s16 = smov %s2979_s17  ;;  %s3594_s17 = smov %s3171_s11 }
 0x282   : > { %s3595_s18 = smov %s3161_s10  ;;  %21 = sbr.rel (!%p19_p4) target bundleno = 7 (0x7), region = 101 }
 0x289   :  { %2313 = vsyncpa [#allocation3], 1 }
 0x28a   :  { %2315 = vsyncpa [#allocation3 + $0x1], 1 }
 0x28b   :  { %2316 = vsyncpa [#allocation6], 1 }
 0x28c   :  { %2317 = vsyncpa [#allocation9], 1 }
 0x28d   :  { %2318 = vsyncpa [#allocation4], 1 }
 0x28e   :  { %2320 = vsyncpa [#allocation4 + $0x1], 1 }

</bundles_post_ra>
